<compile_context>
chip_gen: v6e
topology: v6e:2x2x1
jax: 0.10.0
libtpu: 0.0.40
codegen_flags: <defaults>
</compile_context>

<pallas_src>
import functools

import jax
import jax.numpy as jnp
from jax.experimental import pallas as pl
from jax.experimental.pallas import tpu as pltpu


# --------------------------------------------------------------------------
# Kernel body: whole 3-layer MLP fused, feature-major (batch on lanes).
# --------------------------------------------------------------------------
def _mlp_kernel(x_ref, w1_ref, b1_ref, w2_ref, b2_ref, w3_ref, b3_ref, o_ref):
    # x: (13, TILE_B) compute dtype; weights: PyTorch (out, in) layout;
    # biases: (out, 1) f32.  All matmuls accumulate in f32 on the MXU; the
    # bias+ReLU epilogue stays f32 (v5e has no bf16 VALU/EUP).
    x = x_ref[...]                                                      # (13, TB)
    h1 = jnp.dot(w1_ref[...], x, preferred_element_type=jnp.float32)   # (64, TB) f32
    h1 = jnp.maximum(h1 + b1_ref[...], 0.0).astype(w2_ref.dtype)
    h2 = jnp.dot(w2_ref[...], h1, preferred_element_type=jnp.float32)  # (32, TB) f32
    h2 = jnp.maximum(h2 + b2_ref[...], 0.0).astype(w3_ref.dtype)
    h3 = jnp.dot(w3_ref[...], h2, preferred_element_type=jnp.float32)  # (3, TB) f32
    o_ref[...] = (h3 + b3_ref[...]).astype(o_ref.dtype)


# --------------------------------------------------------------------------
# VMEM accounting (per grid step), including the h1/h2 intermediates.
# --------------------------------------------------------------------------
_VMEM_LIMIT_BYTES = 32 * 1024 * 1024   # explicit scoped-VMEM limit (all chips)


def _round_up(x, m):
    return ((x + m - 1) // m) * m


def _estimate_vmem_bytes(tile_b, compute_dtype):
    cs = jnp.dtype(compute_dtype).itemsize
    pad8 = lambda r: _round_up(r, 8)                 # sublane padding
    total = 0
    total += 2 * pad8(13) * tile_b * cs              # x tile, double-buffered
    total += 2 * pad8(3) * tile_b * 4                # f32 out tile, double-buffered
    total += pad8(64) * tile_b * 4                   # h1 f32 (MXU accumulate)
    total += pad8(32) * tile_b * 4                   # h2 f32
    if cs != 4:                                      # bf16 copies fed to next MXU
        total += pad8(64) * tile_b * cs
        total += pad8(32) * tile_b * cs
    total += 1 << 20                                 # weights/biases + compiler slack
    return total


def _pick_tile_b(tile_b, batch, compute_dtype):
    tile_b = max(128, (tile_b // 128) * 128)
    tile_b = min(tile_b, _round_up(batch, 128))
    budget = int(0.75 * _VMEM_LIMIT_BYTES)
    while tile_b > 128 and _estimate_vmem_bytes(tile_b, compute_dtype) > budget:
        tile_b -= 128
    return tile_b


# --------------------------------------------------------------------------
# Feature-major entry point: x_t (13, B) -> (3, B).  No wrapper transposes.
# --------------------------------------------------------------------------
def mlp_forward_feature_major(x_t, params, *, tile_b=16384,
                              compute_dtype=jnp.bfloat16):
    w1, b1, w2, b2, w3, b3 = params
    in_dim, B = x_t.shape
    out_dim = w3.shape[0]

    tile_b = _pick_tile_b(tile_b, B, compute_dtype)
    b_pad = _round_up(B, tile_b)
    grid = (b_pad // tile_b,)

    x_c = x_t.astype(compute_dtype)
    if b_pad != B:
        x_c = jnp.pad(x_c, ((0, 0), (0, b_pad - B)))

    w1c, w2c, w3c = (w.astype(compute_dtype) for w in (w1, w2, w3))
    b1c, b2c, b3c = (b.astype(jnp.float32).reshape(-1, 1) for b in (b1, b2, b3))

    # Weights/biases: full-array blocks with constant index_map -> VMEM-resident.
    full = lambda a: pl.BlockSpec(a.shape, lambda i: (0,) * a.ndim)

    cs = jnp.dtype(compute_dtype).itemsize
    cost = pl.CostEstimate(
        flops=2 * b_pad * (13 * 64 + 64 * 32 + 32 * 3),
        transcendentals=0,
        bytes_accessed=(
            b_pad * in_dim * cs                      # x read
            + b_pad * out_dim * 4                    # out write
            + sum(int(w.size) * cs for w in (w1, w2, w3))
            + sum(int(b.size) * 4 for b in (b1, b2, b3))
        ),
    )

    out_t = pl.pallas_call(
        _mlp_kernel,
        out_shape=jax.ShapeDtypeStruct((out_dim, b_pad), jnp.float32),
        grid=grid,
        in_specs=[
            pl.BlockSpec((in_dim, tile_b), lambda i: (0, i)),   # x tile (pipelined)
            full(w1c), full(b1c),
            full(w2c), full(b2c),
            full(w3c), full(b3c),
        ],
        out_specs=pl.BlockSpec((out_dim, tile_b), lambda i: (0, i)),
        compiler_params=pltpu.CompilerParams(
            # On v7x, profile to confirm the batch axis is split across both
            # TensorCores; switch to pltpu.CORE_PARALLEL if it is not.
            dimension_semantics=("parallel",),
            vmem_limit_bytes=_VMEM_LIMIT_BYTES,
        ),
        cost_estimate=cost,
    )(x_c, w1c, b1c, w2c, b2c, w3c, b3c)

    return out_t[:, :B]                               # (3, B) f32


# --------------------------------------------------------------------------
# Row-major (PyTorch-contract) wrapper: x (B, 13) -> (B, 3).
# Jit this so the transpose/cast/pad fuse into a single pass; for large-B
# production use, prefer the feature-major entry point above.
# --------------------------------------------------------------------------
def mlp_forward(x, params, *, tile_b=16384, compute_dtype=jnp.bfloat16):
    out_t = mlp_forward_feature_major(
        x.T, params, tile_b=tile_b, compute_dtype=compute_dtype)
    return out_t.T                                    # (B, 3) f32


# --------------------------------------------------------------------------
# Params / reference
# --------------------------------------------------------------------------
def init_params(key):
    # nn.Linear default init (uniform +/- 1/sqrt(fan_in)), PyTorch (out, in) layout.
    dims = [(13, 64), (64, 32), (32, 3)]
    params = []
    for i, (fan_in, fan_out) in enumerate(dims):
        kw, kb = jax.random.split(jax.random.fold_in(key, i))
        bound = 1.0 / jnp.sqrt(fan_in)
        w = jax.random.uniform(kw, (fan_out, fan_in), jnp.float32, -bound, bound)
        b = jax.random.uniform(kb, (fan_out,), jnp.float32, -bound, bound)
        params += [w, b]
    return tuple(params)


def reference_forward(x, params):
    w1, b1, w2, b2, w3, b3 = params
    h = jnp.maximum(x @ w1.T + b1, 0.0)
    h = jnp.maximum(h @ w2.T + b2, 0.0)
    return h @ w3.T + b3


if __name__ == "__main__":
    key = jax.random.PRNGKey(0)
    kx, kp = jax.random.split(key)
    batch = 8
    x = jax.random.normal(kx, (batch, 13), jnp.float32)
    params = init_params(kp)

    ref = reference_forward(x, params)

    fwd = jax.jit(mlp_forward, static_argnames=("tile_b", "compute_dtype"))

    # f32 path: exact semantics of the PyTorch module.
    out = jax.block_until_ready(fwd(x, params, compute_dtype=jnp.float32))
    assert out.shape == (batch, 3)
    assert jnp.allclose(out, ref, atol=1e-5, rtol=1e-5)

    # Default bf16 compute path (halved input HBM traffic; f32 accumulate).
    out_bf16 = jax.block_until_ready(fwd(x, params))
    assert out_bf16.shape == (batch, 3)
    assert jnp.allclose(out_bf16, ref, atol=5e-2, rtol=5e-2)

    # Feature-major fast path (no wrapper-side transposes at all).
    fwd_fm = jax.jit(mlp_forward_feature_major,
                     static_argnames=("tile_b", "compute_dtype"))
    out_fm = jax.block_until_ready(fwd_fm(x.T, params, compute_dtype=jnp.float32))
    assert out_fm.shape == (3, batch)
    assert jnp.allclose(out_fm.T, ref, atol=1e-5, rtol=1e-5)

    print("KERNEL_OK")
</pallas_src>

<mosaic_0001>
module attributes {stable_mosaic.version = 11 : i64} {
  func.func @_mlp_kernel(%arg0: i32, %arg1: memref<13x128xf32, #tpu.memory_space<vmem>>, %arg2: memref<64x13xf32, #tpu.memory_space<vmem>>, %arg3: memref<64x1xf32, #tpu.memory_space<vmem>>, %arg4: memref<32x64xf32, #tpu.memory_space<vmem>>, %arg5: memref<32x1xf32, #tpu.memory_space<vmem>>, %arg6: memref<3x32xf32, #tpu.memory_space<vmem>>, %arg7: memref<3x1xf32, #tpu.memory_space<vmem>>, %arg8: memref<3x128xf32, #tpu.memory_space<vmem>>) attributes {dimension_semantics = [#tpu.dimension_semantics<parallel>], iteration_bounds = array<i64: 1>, scalar_prefetch = 0 : i64, scratch_operands = 0 : i64, tpu.core_type = #tpu.core_type<tc>, window_params = [{transform_indices = @transform_0, window_bounds = array<i64: 13, 128>}, {pipeline_mode = #tpu.pipeline_mode<synchronous>, transform_indices = @transform_1, window_bounds = array<i64: 64, 13>}, {pipeline_mode = #tpu.pipeline_mode<synchronous>, transform_indices = @transform_2, window_bounds = array<i64: 64, 1>}, {pipeline_mode = #tpu.pipeline_mode<synchronous>, transform_indices = @transform_3, window_bounds = array<i64: 32, 64>}, {pipeline_mode = #tpu.pipeline_mode<synchronous>, transform_indices = @transform_4, window_bounds = array<i64: 32, 1>}, {pipeline_mode = #tpu.pipeline_mode<synchronous>, transform_indices = @transform_5, window_bounds = array<i64: 3, 32>}, {pipeline_mode = #tpu.pipeline_mode<synchronous>, transform_indices = @transform_6, window_bounds = array<i64: 3, 1>}, {transform_indices = @transform_7, window_bounds = array<i64: 3, 128>}]} {
    %c0 = arith.constant 0 : index
    %c0_0 = arith.constant 0 : index
    %0 = vector.load %arg1[%c0, %c0_0] : memref<13x128xf32, #tpu.memory_space<vmem>>, vector<13x128xf32>
    %c0_1 = arith.constant 0 : index
    %c0_2 = arith.constant 0 : index
    %1 = vector.load %arg2[%c0_1, %c0_2] : memref<64x13xf32, #tpu.memory_space<vmem>>, vector<64x13xf32>
    %cst = arith.constant dense<0.000000e+00> : vector<64x128xf32>
    %2 = tpu.matmul %1, %0, %cst {dimension_numbers = #tpu.dot_dimension_numbers<[1], [0], [0], [1], [0, 0, 1, 1], [], []>} : vector<64x13xf32>, vector<13x128xf32>, vector<64x128xf32> -> vector<64x128xf32>
    %c0_3 = arith.constant 0 : index
    %c0_4 = arith.constant 0 : index
    %3 = vector.load %arg3[%c0_3, %c0_4] : memref<64x1xf32, #tpu.memory_space<vmem>>, vector<64x1xf32>
    %4 = vector.broadcast %3 : vector<64x1xf32> to vector<64x128xf32>
    %5 = arith.addf %2, %4 : vector<64x128xf32>
    %cst_5 = arith.constant 0.000000e+00 : f32
    %6 = vector.broadcast %cst_5 : f32 to vector<64x128xf32>
    %7 = arith.maximumf %5, %6 : vector<64x128xf32>
    %c0_6 = arith.constant 0 : index
    %c0_7 = arith.constant 0 : index
    %8 = vector.load %arg4[%c0_6, %c0_7] : memref<32x64xf32, #tpu.memory_space<vmem>>, vector<32x64xf32>
    %cst_8 = arith.constant dense<0.000000e+00> : vector<32x128xf32>
    %9 = tpu.matmul %8, %7, %cst_8 {dimension_numbers = #tpu.dot_dimension_numbers<[1], [0], [0], [1], [0, 0, 1, 1], [], []>} : vector<32x64xf32>, vector<64x128xf32>, vector<32x128xf32> -> vector<32x128xf32>
    %c0_9 = arith.constant 0 : index
    %c0_10 = arith.constant 0 : index
    %10 = vector.load %arg5[%c0_9, %c0_10] : memref<32x1xf32, #tpu.memory_space<vmem>>, vector<32x1xf32>
    %11 = vector.broadcast %10 : vector<32x1xf32> to vector<32x128xf32>
    %12 = arith.addf %9, %11 : vector<32x128xf32>
    %cst_11 = arith.constant 0.000000e+00 : f32
    %13 = vector.broadcast %cst_11 : f32 to vector<32x128xf32>
    %14 = arith.maximumf %12, %13 : vector<32x128xf32>
    %c0_12 = arith.constant 0 : index
    %c0_13 = arith.constant 0 : index
    %15 = vector.load %arg6[%c0_12, %c0_13] : memref<3x32xf32, #tpu.memory_space<vmem>>, vector<3x32xf32>
    %cst_14 = arith.constant dense<0.000000e+00> : vector<3x128xf32>
    %16 = tpu.matmul %15, %14, %cst_14 {dimension_numbers = #tpu.dot_dimension_numbers<[1], [0], [0], [1], [0, 0, 1, 1], [], []>} : vector<3x32xf32>, vector<32x128xf32>, vector<3x128xf32> -> vector<3x128xf32>
    %c0_15 = arith.constant 0 : index
    %c0_16 = arith.constant 0 : index
    %17 = vector.load %arg7[%c0_15, %c0_16] : memref<3x1xf32, #tpu.memory_space<vmem>>, vector<3x1xf32>
    %18 = vector.broadcast %17 : vector<3x1xf32> to vector<3x128xf32>
    %19 = arith.addf %16, %18 : vector<3x128xf32>
    %c0_17 = arith.constant 0 : index
    %c0_18 = arith.constant 0 : index
    %20 = vector.load %arg8[%c0_17, %c0_18] : memref<3x128xf32, #tpu.memory_space<vmem>>, vector<3x128xf32>
    tpu.vector_store %arg8[%c0_17, %c0_18], %19 {strides = array<i32>} : memref<3x128xf32, #tpu.memory_space<vmem>>, vector<3x128xf32>,
    return
  }
  func.func @transform_0(%arg0: i32) -> (i32, i32) {
    %c0_i32 = arith.constant 0 : i32
    %c0_i32_0 = arith.constant 0 : i32
    return %c0_i32, %arg0 : i32, i32
  }
  func.func @transform_1(%arg0: i32) -> (i32, i32) {
    %c0_i32 = arith.constant 0 : i32
    %c0_i32_0 = arith.constant 0 : i32
    %c0_i32_1 = arith.constant 0 : i32
    return %c0_i32, %c0_i32_0 : i32, i32
  }
  func.func @transform_2(%arg0: i32) -> (i32, i32) {
    %c0_i32 = arith.constant 0 : i32
    %c0_i32_0 = arith.constant 0 : i32
    %c0_i32_1 = arith.constant 0 : i32
    return %c0_i32, %c0_i32_0 : i32, i32
  }
  func.func @transform_3(%arg0: i32) -> (i32, i32) {
    %c0_i32 = arith.constant 0 : i32
    %c0_i32_0 = arith.constant 0 : i32
    %c0_i32_1 = arith.constant 0 : i32
    return %c0_i32, %c0_i32_0 : i32, i32
  }
  func.func @transform_4(%arg0: i32) -> (i32, i32) {
    %c0_i32 = arith.constant 0 : i32
    %c0_i32_0 = arith.constant 0 : i32
    %c0_i32_1 = arith.constant 0 : i32
    return %c0_i32, %c0_i32_0 : i32, i32
  }
  func.func @transform_5(%arg0: i32) -> (i32, i32) {
    %c0_i32 = arith.constant 0 : i32
    %c0_i32_0 = arith.constant 0 : i32
    %c0_i32_1 = arith.constant 0 : i32
    return %c0_i32, %c0_i32_0 : i32, i32
  }
  func.func @transform_6(%arg0: i32) -> (i32, i32) {
    %c0_i32 = arith.constant 0 : i32
    %c0_i32_0 = arith.constant 0 : i32
    %c0_i32_1 = arith.constant 0 : i32
    return %c0_i32, %c0_i32_0 : i32, i32
  }
  func.func @transform_7(%arg0: i32) -> (i32, i32) {
    %c0_i32 = arith.constant 0 : i32
    %c0_i32_0 = arith.constant 0 : i32
    return %c0_i32, %arg0 : i32, i32
  }
}

</mosaic_0001>

<bundles_post_ra>
// kernel: mlp_forward.1
= control target key start
LH: loop header
LB: loop body
LE: loop exit
PB: predicated region body
PF: predicated region fallthrough
CT: control target
= control target key end

     0   :  { %vm109_vm0 = vcmask 1044480   ;;  %vm84_vm1 = vcmask 105472   ;;  %v537_v3 = vmov 0   ;;  %vm254_vm2 = vcmask 523264   ;;  %s679_s0 = inlined_call_operand.vmem [shape: f32[13,128], index: 0, kind: input, shape index: {}]   ;;  %s680_s1 = inlined_call_operand.vmem [shape: f32[64,13], index: 1, kind: input, shape index: {}]   ;;  %s681_s2 = inlined_call_operand.vmem [shape: f32[64,1], index: 2, kind: input, shape index: {}]   ;;  %s682_s4 = inlined_call_operand.vmem [shape: f32[32,1], index: 4, kind: input, shape index: {}]   ;;  %s683_s6 = inlined_call_operand.vmem [shape: f32[3,1], index: 6, kind: input, shape index: {}]   ;;  %s684_s3 = inlined_call_operand.vmem [shape: f32[32,64], index: 3, kind: input, shape index: {}]   ;;  %s685_s5 = inlined_call_operand.vmem [shape: f32[3,32], index: 5, kind: input, shape index: {}]   ;;  %s686_s7 = inlined_call_operand.vmem [shape: f32[3,128], index: 7, kind: output, shape index: {}]  }
   0x1   :  { %v27_v0 = vld [vmem:[%s679_s0 + $0x8] sm:$0x1f]  ;;  %v26_v1 = vld [vmem:[%s679_s0] sm:$0xff]  ;;  %535 = vset.pattern.permute.xlu0 %v537_v3  ;;  %536 = vset.pattern.permute.xlu1 %v537_v3  ;;  %v30_v5 = vld [vmem:[%s680_s1 + $0x10] sm:$0xff]  ;;  %v538_v60 = vmov 0.0   ;;  %vm539_vm3 = vmmov 0  }
   0x2   :  { %v28_v2 = vld [vmem:[%s680_s1] sm:$0xff]  ;;  %483 = vmatprep.subr.msk.mxu0 %vm109_vm0, %v27_v0  ;;  %v29_v4 = vld [vmem:[%s680_s1 + $0x8] sm:$0xff]  ;;  %v43_v6 = vld [vmem:[%s681_s2 + $0x38] sm:$0xff]  ;;  %vm363_vm4 = vcmask 261120  }
   0x3   :  { %487 = vmatprep.mubr.msk.f32.mxu0 %vm84_vm1, %v28_v2  ;;  %484 = vmatpush3.msk.msra.mxu0 %vm109_vm0, %v27_v0  ;;  %v41_v7 = vld [vmem:[%s681_s2 + $0x28] sm:$0xff]  ;;  %v42_v8 = vld [vmem:[%s681_s2 + $0x30] sm:$0xff]  ;;  %v31_v9 = vld [vmem:[%s680_s1 + $0x18] sm:$0xff] }
   0x4   :  { %485 = vmatprep.subr.mxu0 %v26_v1  ;;  %81 = vperm.xlu0 %535, %v43_v6   ;;  %v40_v10 = vld [vmem:[%s681_s2 + $0x20] sm:$0xff]  ;;  %v39_v12 = vld [vmem:[%s681_s2 + $0x18] sm:$0xff]  ;;  %v33_v13 = vld [vmem:[%s680_s1 + $0x28] sm:$0xff] }
   0x5   :  { %486 = vmatpush3.msra.mxu0 %v26_v1  ;;  %71 = vperm.xlu1 %536, %v41_v7   ;;  %v32_v11 = vld [vmem:[%s680_s1 + $0x20] sm:$0xff]  ;;  %v38_v14 = vld [vmem:[%s681_s2 + $0x10] sm:$0xff]  ;;  %v37_v16 = vld [vmem:[%s681_s2 + $0x8] sm:$0xff] }
   0x6   :  { %488 = vmatmul.mubr.msk.f32.vlgmr.msra.gmra.mxu0 %vm84_vm1, %v29_v4  ;;  %v34_v15 = vld [vmem:[%s680_s1 + $0x30] sm:$0xff]  ;;  %v35_v17 = vld [vmem:[%s680_s1 + $0x38] sm:$0xff]  ;;  %v36_v18 = vld [vmem:[%s681_s2] sm:$0xff]  ;;  %521 = vmatprep.subr.mxu0 %v538_v60 }
   0x7   :  { %490 = vmatprep.mubr.msk.f32.mxu0 %vm84_vm1, %v30_v5  ;;  %v233_v19 = vld [vmem:[%s682_s4 + $0x18] sm:$0xff]  ;;  %v232_v20 = vld [vmem:[%s682_s4 + $0x10] sm:$0xff]  ;;  %v231_v21 = vld [vmem:[%s682_s4 + $0x8] sm:$0xff] }
   0x8   :  { %76 = vperm.xlu0 %535, %v42_v8   ;;  %v230_v22 = vld [vmem:[%s682_s4] sm:$0xff]  ;;  %v227_v57 = vld [vmem:[%s684_s3 + $0x8] sm:$0xff]  ;;  %v228_v58 = vld [vmem:[%s684_s3 + $0x10] sm:$0xff] }
   0x9   :  { %66 = vperm.xlu1 %536, %v40_v10   ;;  %v357_v23 = vld [vmem:[%s683_s6] sm:$0x7]  ;;  %v229_v59 = vld [vmem:[%s684_s3 + $0x18] sm:$0xff] }
   0xa   :  { %491 = vmatmul.mubr.msk.f32.gmra.mxu0 %vm84_vm1, %v31_v9  ;;  %v226_v24 = vld [vmem:[%s684_s3] sm:$0xff] }
   0xb   :  { %493 = vmatprep.mubr.msk.f32.mxu0 %vm84_vm1, %v32_v11  ;;  %515 = vmatprep.mubr.msk.f32.mxu1 %vm254_vm2, %v226_v24 }
   0xc   :  { %61 = vperm.xlu0 %535, %v39_v12  }
   0xd   :  { %56 = vperm.xlu1 %536, %v38_v14  }
   0xe   :  { %494 = vmatmul.mubr.msk.f32.gmra.mxu0 %vm84_vm1, %v33_v13  ;;  %v356_v13 = vld [vmem:[%s685_s5] sm:$0x7] }
   0xf   :  { %496 = vmatprep.mubr.msk.f32.mxu0 %vm84_vm1, %v34_v15 }
  0x10   :  { %51 = vperm.xlu0 %535, %v37_v16  }
  0x11   :  { %46 = vperm.xlu1 %536, %v36_v18  }
  0x12   :  { %497 = vmatmul.mubr.msk.f32.gmra.mxu0 %vm84_vm1, %v35_v17 }
  0x13   :  { %529 = vmatprep.mubr.msk.f32.mxu0 %vm539_vm3, %v538_v60 }
  0x14   :  { %251 = vperm.xlu0 %535, %v233_v19  }
  0x15   :  { %246 = vperm.xlu1 %536, %v232_v20  }
  0x18   :  { %241 = vperm.xlu0 %535, %v231_v21  }
  0x19   :  { %236 = vperm.xlu1 %536, %v230_v22  }
  0x1c   :  { %360 = vperm.xlu0 %535, %v357_v23  }
  0x7f   :  { %v82_v27 = vpop.permute.xlu0 %81 }
  0x80   :  { %v72_v28 = vpop.permute.xlu1 %71 }
  0x83   :  { %v77_v32 = vpop.permute.xlu0 %76 }
  0x84   :  { %v67_v33 = vpop.permute.xlu1 %66 }
  0x87   :  { %v62_v41 = vpop.permute.xlu0 %61 }
  0x88   :  { %v57_v42 = vpop.permute.xlu1 %56 }
  0x8b   :  { %v52_v49 = vpop.permute.xlu0 %51 }
  0x8c   :  { %v47_v50 = vpop.permute.xlu1 %46 }
  0x8f   :  { %v252_v61 = vpop.permute.xlu0 %251 }
  0x90   :  { %v247_v63 = vpop.permute.xlu1 %246 }
  0x93   :  { %v242_v3 = vpop.permute.xlu0 %241 }
  0x94   :  { %v237_v8 = vpop.permute.xlu1 %236 }
  0x97   :  { %v361_v14 = vpop.permute.xlu0 %360 }
  0xc6   :  { %v489_v25 = vpop.f32.mrf.mxu0 }
  0xc7   :  { %v185_v51 = vadd.f32 %v489_v25, %v52_v49 }
  0xc8   :  { %v179_v26 = vpop.f32.mrf.mxu0 }
  0xc9   :  { %v180_v53 = vadd.f32 %v179_v26, %v47_v50  ;;  %v219_v55 = vmax.f32 %v185_v51, 0.0 }
  0xca   :  { %v492_v29 = vpop.f32.mrf.mxu0 }
  0xcb   :  { %v195_v45 = vadd.f32 %v492_v29, %v62_v41  ;;  %v218_v56 = vmax.f32 %v180_v53, 0.0 }
  0xcc   :  { %v189_v30 = vpop.f32.mrf.mxu0 }
  0xcd   :  { %v190_v47 = vadd.f32 %v189_v30, %v57_v42  ;;  %v221_v52 = vmax.f32 %v195_v45, 0.0 }
  0xce   :  { %v495_v31 = vpop.f32.mrf.mxu0 }
  0xcf   :  { %v205_v38 = vadd.f32 %v495_v31, %v72_v28  ;;  %v220_v54 = vmax.f32 %v190_v47, 0.0 }
  0xd0   :  { %v199_v34 = vpop.f32.mrf.mxu0 }
  0xd1   :  { %v200_v43 = vadd.f32 %v199_v34, %v67_v33  ;;  %v223_v46 = vmax.f32 %v205_v38, 0.0 }
  0xd2   :  { %v498_v35 = vpop.f32.mrf.mxu0 }
  0xd3   :  { %v215_v36 = vadd.f32 %v498_v35, %v82_v27  ;;  %v222_v48 = vmax.f32 %v200_v43, 0.0 }
  0xd4   :  { %v209_v37 = vpop.f32.mrf.mxu0 }
  0xd5   :  { %v225_v39 = vmax.f32 %v215_v36, 0.0  ;;  %v210_v40 = vadd.f32 %v209_v37, %v77_v32 }
  0xd7   :  { %v224_v44 = vmax.f32 %v210_v40, 0.0  ;;  %499 = vmatprep.subr.mxu1 %v225_v39 }
  0xd8   :  { %500 = vmatpush3.msra.mxu1 %v225_v39 }
  0xd9   :  { %501 = vmatprep.subr.mxu1 %v224_v44 }
  0xda   :  { %502 = vmatpush3.msra.mxu1 %v224_v44 }
  0xdb   :  { %503 = vmatprep.subr.mxu1 %v223_v46 }
  0xdc   :  { %504 = vmatpush3.msra.mxu1 %v223_v46 }
  0xdd   :  { %505 = vmatprep.subr.mxu1 %v222_v48 }
  0xde   :  { %506 = vmatpush3.msra.mxu1 %v222_v48 }
  0xdf   :  { %507 = vmatprep.subr.mxu1 %v221_v52 }
  0xe0   :  { %508 = vmatpush3.msra.mxu1 %v221_v52 }
  0xe1   :  { %509 = vmatprep.subr.mxu1 %v220_v54 }
  0xe2   :  { %510 = vmatpush3.msra.mxu1 %v220_v54 }
  0xe3   :  { %511 = vmatprep.subr.mxu1 %v219_v55 }
  0xe4   :  { %512 = vmatpush3.msra.mxu1 %v219_v55 }
  0xe5   :  { %513 = vmatprep.subr.mxu1 %v218_v56 }
  0xe6   :  { %514 = vmatpush3.msra.mxu1 %v218_v56 }
  0xe7   :  { %516 = vmatmul.mubr.msk.f32.vlgmr.msra.gmra.mxu1 %vm254_vm2, %v227_v57 }
  0xe8   :  { %518 = vmatprep.mubr.msk.f32.mxu1 %vm254_vm2, %v228_v58 }
  0xeb   :  { %519 = vmatmul.mubr.msk.f32.gmra.mxu1 %vm254_vm2, %v229_v59 }
 0x1a7   :  { %v517_v62 = vpop.f32.mrf.mxu1 }
 0x1a8   :  { %v339_v5 = vadd.f32 %v517_v62, %v242_v3 }
 0x1a9   :  { %v333_v0 = vpop.f32.mrf.mxu1 }
 0x1aa   :  { %v334_v9 = vadd.f32 %v333_v0, %v237_v8  ;;  %v353_v11 = vmax.f32 %v339_v5, 0.0 }
 0x1ab   :  { %v520_v1 = vpop.f32.mrf.mxu1 }
 0x1ac   :  { %v349_v2 = vadd.f32 %v520_v1, %v252_v61  ;;  %v352_v12 = vmax.f32 %v334_v9, 0.0 }
 0x1ad   :  { %v343_v4 = vpop.f32.mrf.mxu1 }
 0x1ae   :  { %v355_v6 = vmax.f32 %v349_v2, 0.0  ;;  %v344_v7 = vadd.f32 %v343_v4, %v247_v63 }
 0x1b0   :  { %v354_v10 = vmax.f32 %v344_v7, 0.0  ;;  %522 = vmatpush3.msra.mxu0 %v355_v6 }
 0x1b1   :  { %523 = vmatprep.subr.mxu0 %v538_v60 }
 0x1b2   :  { %524 = vmatpush3.msra.mxu0 %v354_v10 }
 0x1b3   :  { %525 = vmatprep.subr.mxu0 %v538_v60 }
 0x1b4   :  { %526 = vmatpush3.msra.mxu0 %v353_v11 }
 0x1b5   :  { %527 = vmatprep.subr.mxu0 %v538_v60 }
 0x1b6   :  { %528 = vmatpush3.msra.mxu0 %v352_v12 }
 0x1b7   :  { %530 = vmatmul.mubr.msk.f32.vlgmr.msra.gmra.mxu0 %vm363_vm4, %v356_v13 }
 0x277   :  { %v433_v15 = vpop.f32.mrf.mxu0 }
 0x278   :  { %v434_v16 = vadd.f32 %v433_v15, %v361_v14 }
 0x279   :  { %v531_v17 = vpop.f32.mrf.mxu0 }
 0x27a   :  { %437 = vst [vmem:[%s686_s7] sm:$0x7] %v434_v16 }

</bundles_post_ra>
